<compile_context>
chip_gen: v7x
topology: tpu7x:2x2x1
jax: 0.10.0
libtpu: 0.0.40
codegen_flags: <defaults>
</compile_context>

<pallas_src>
import jax
import jax.numpy as jnp
from jax.experimental import pallas as pl
from jax.experimental.pallas import tpu as pltpu


# ---------------------------------------------------------------------------
# Fast path: embedding tables resident in VMEM (small vocabularies).
# ---------------------------------------------------------------------------
def _state_repr_vmem_kernel(uidx_ref, midx_ref,            # scalar prefetch (SMEM)
                            user_tab_ref, item_tab_ref,    # VMEM-resident tables
                            w_ref, b_ref,                  # SMEM conv params
                            out_ref,                       # (tb, out_pad) VMEM
                            u_buf, drr_buf):               # scratch (tb, E) f32
    i = pl.program_id(0)
    TB, E = u_buf.shape
    N = w_ref.shape[0]
    pad_w = out_ref.shape[1] - 3 * E

    # Per batch row: dynamic-slice gather from the VMEM tables (no DMA), and
    # fold the Conv1d(N->1, k=1) weighted sum on the fly.
    for b in range(TB):                                    # static unroll, TB small
        row = i * TB + b
        uid = uidx_ref[row]
        u_buf[pl.ds(b, 1), :] = (
            user_tab_ref[pl.ds(uid, 1), :].astype(jnp.float32))
        acc = jnp.zeros((1, E), jnp.float32)
        for n in range(N):
            mid = midx_ref[row * N + n]
            acc = acc + w_ref[n] * item_tab_ref[pl.ds(mid, 1), :].astype(jnp.float32)
        drr_buf[pl.ds(b, 1), :] = acc + b_ref[0]

    u_emb = u_buf[...]                                     # (TB, E)
    drr = drr_buf[...]                                     # (TB, E)

    # Single lane-dense store of [u, u*drr, drr] (+ zero lane padding).
    parts = [u_emb, u_emb * drr, drr]
    if pad_w > 0:
        parts.append(jnp.zeros((TB, pad_w), jnp.float32))
    out_ref[...] = jnp.concatenate(parts, axis=1)


# ---------------------------------------------------------------------------
# Fallback path: large vocabularies -> tables stay in HBM, gather rows by DMA.
# (Not exercised by the demo sizes.)
# ---------------------------------------------------------------------------
def _state_repr_hbm_kernel(uidx_ref, midx_ref,             # scalar prefetch (SMEM)
                           user_tab_hbm, item_tab_hbm,     # HBM (pl.ANY)
                           w_ref, b_ref,                   # SMEM
                           out_ref,                        # VMEM output tile
                           u_buf, it_buf, sem):            # scratch
    i = pl.program_id(0)
    TB, E = u_buf.shape
    N = it_buf.shape[0]
    pad_w = out_ref.shape[1] - 3 * E

    # Issue all (N+1)*TB row gathers on ONE shared DMA semaphore, then drain it
    # with per-copy waits: because the semaphore counts cumulative completions,
    # only the earliest waits can block; the rest fall through immediately.
    copies = []
    for b in range(TB):
        row = i * TB + b
        uid = uidx_ref[row]
        cp = pltpu.make_async_copy(user_tab_hbm.at[uid], u_buf.at[b], sem)
        cp.start()
        copies.append(cp)
        for n in range(N):
            mid = midx_ref[row * N + n]
            cp = pltpu.make_async_copy(item_tab_hbm.at[mid], it_buf.at[n, b], sem)
            cp.start()
            copies.append(cp)
    for cp in copies:
        cp.wait()

    u_emb = u_buf[...].astype(jnp.float32)                 # (TB, E)

    drr = jnp.zeros((TB, E), jnp.float32)
    for n in range(N):
        drr = drr + w_ref[n] * it_buf[n].astype(jnp.float32)
    drr = drr + b_ref[0]

    parts = [u_emb, u_emb * drr, drr]
    if pad_w > 0:
        parts.append(jnp.zeros((TB, pad_w), jnp.float32))
    out_ref[...] = jnp.concatenate(parts, axis=1)
    # TODO(synk): overlap the HBM gathers with the weighted-sum (per-slot
    # interleaved waits / cross-step double buffering) for very large vocabs.


# ---------------------------------------------------------------------------
# Wrapper
# ---------------------------------------------------------------------------
def state_repr_forward(user, memory, user_tab, item_tab, conv_w, conv_b,
                       *, tb=32, vmem_table_budget=4 * 1024 * 1024):
    """user: (B,) int, memory: (B, N) int -> (B, 3E) float32."""
    B = user.shape[0]
    N = memory.shape[1]
    E = user_tab.shape[1]
    item_num = item_tab.shape[0] - 1                       # padding row index

    # Batch tile: multiple of 8 sublanes, no larger than the (padded) batch.
    tb = max(8, min(int(tb), pl.cdiv(B, 8) * 8))
    b_pad = pl.cdiv(B, tb) * tb
    # Give the "parallel" batch grid at least 2 steps when possible so v7x's
    # two TensorCores both get work (no-op for the tiny demo batch).
    if b_pad == tb and tb >= 16 and tb % 16 == 0:
        tb = tb // 2
    n_steps = b_pad // tb

    out_pad = pl.cdiv(3 * E, 128) * 128                    # lane-dense output width

    # Pad batch: user idx 0 (valid row), memory idx item_num (all-zero padding row).
    uidx = jnp.zeros((b_pad,), jnp.int32).at[:B].set(user.astype(jnp.int32))
    midx = jnp.full((b_pad, N), item_num, jnp.int32).at[:B].set(memory.astype(jnp.int32))
    midx_flat = midx.reshape(-1)                           # 1-D SMEM scalar prefetch
    # TODO(synk): for very large B, stream per-tile index slices instead of
    # scalar-prefetching the whole (b_pad*N,) array into SMEM.

    w = conv_w.reshape(N).astype(jnp.float32)
    bias = conv_b.reshape(1).astype(jnp.float32)

    table_bytes = (user_tab.size * user_tab.dtype.itemsize
                   + item_tab.size * item_tab.dtype.itemsize)
    cost = pl.CostEstimate(
        flops=int(b_pad * E * (2 * N + 2)),
        transcendentals=0,
        bytes_accessed=int(table_bytes + 4 * (uidx.size + midx_flat.size)
                           + 4 * b_pad * out_pad),
    )

    if table_bytes <= vmem_table_budget:
        # -------- fast path: tables resident in VMEM, in-VMEM gathers --------
        out = pl.pallas_call(
            _state_repr_vmem_kernel,
            out_shape=jax.ShapeDtypeStruct((b_pad, out_pad), jnp.float32),
            grid_spec=pltpu.PrefetchScalarGridSpec(
                num_scalar_prefetch=2,                     # uidx, midx_flat -> SMEM
                grid=(n_steps,),
                in_specs=[
                    # Full-array blocks with a constant index_map: DMA'd once,
                    # stay resident across all grid steps.
                    pl.BlockSpec(user_tab.shape, lambda i, *_: (0, 0)),
                    pl.BlockSpec(item_tab.shape, lambda i, *_: (0, 0)),
                    pl.BlockSpec(memory_space=pltpu.MemorySpace.SMEM),  # conv_w
                    pl.BlockSpec(memory_space=pltpu.MemorySpace.SMEM),  # conv_b
                ],
                out_specs=pl.BlockSpec((tb, out_pad), lambda i, *_: (i, 0)),
                scratch_shapes=[
                    pltpu.VMEM((tb, E), jnp.float32),      # gathered user rows
                    pltpu.VMEM((tb, E), jnp.float32),      # drr accumulator
                ],
            ),
            compiler_params=pltpu.CompilerParams(
                dimension_semantics=("parallel",),
                vmem_limit_bytes=32 * 1024 * 1024),
            cost_estimate=cost,
        )(uidx, midx_flat, user_tab, item_tab, w, bias)
    else:
        # -------- large-vocab path: tables in HBM, per-row DMA gathers --------
        out = pl.pallas_call(
            _state_repr_hbm_kernel,
            out_shape=jax.ShapeDtypeStruct((b_pad, out_pad), jnp.float32),
            grid_spec=pltpu.PrefetchScalarGridSpec(
                num_scalar_prefetch=2,
                grid=(n_steps,),
                in_specs=[
                    pl.BlockSpec(memory_space=pl.ANY),     # user_tab stays in HBM
                    pl.BlockSpec(memory_space=pl.ANY),     # item_tab stays in HBM
                    pl.BlockSpec(memory_space=pltpu.MemorySpace.SMEM),  # conv_w
                    pl.BlockSpec(memory_space=pltpu.MemorySpace.SMEM),  # conv_b
                ],
                out_specs=pl.BlockSpec((tb, out_pad), lambda i, *_: (i, 0)),
                scratch_shapes=[
                    pltpu.VMEM((tb, E), user_tab.dtype),   # gathered user rows
                    pltpu.VMEM((N, tb, E), item_tab.dtype),  # gathered item rows
                    pltpu.SemaphoreType.DMA(()),           # one shared DMA sem
                ],
            ),
            compiler_params=pltpu.CompilerParams(
                dimension_semantics=("parallel",),
                vmem_limit_bytes=32 * 1024 * 1024),
            cost_estimate=cost,
        )(uidx, midx_flat, user_tab, item_tab, w, bias)

    return out[:B, :3 * E]


def reference_forward(user, memory, user_tab, item_tab, conv_w, conv_b):
    u = user_tab[user]                                     # (B, E)
    it = item_tab[memory]                                  # (B, N, E)
    drr = jnp.einsum('n,bne->be', conv_w, it) + conv_b     # (B, E)
    return jnp.concatenate([u, u * drr, drr], axis=1)


if __name__ == "__main__":
    # Module hyperparameters (small, consistent with the PyTorch __init__).
    user_num = 16
    item_num = 32          # item table has item_num + 1 rows (padding row)
    N = 5                  # memory length / Conv1d in_channels
    embedding_dim = 32
    B = 2                  # batch

    key = jax.random.PRNGKey(0)
    k_u, k_i, k_w, k_user, k_mem = jax.random.split(key, 5)

    # Deterministic parameter init mirroring State_Repr_Module.initialize():
    user_tab = 0.01 * jax.random.normal(k_u, (user_num, embedding_dim), jnp.float32)
    item_tab = 0.01 * jax.random.normal(k_i, (item_num + 1, embedding_dim), jnp.float32)
    item_tab = item_tab.at[-1].set(0.0)                    # padding_idx row zeroed
    conv_w = jax.random.uniform(k_w, (N,), jnp.float32)    # nn.init.uniform_
    conv_b = jnp.zeros((), jnp.float32)                    # bias zeroed

    # Example inputs.
    user = jax.random.randint(k_user, (B,), 0, user_num, dtype=jnp.int32)
    memory = jax.random.randint(k_mem, (B, N), 0, item_num + 1, dtype=jnp.int32)

    out = state_repr_forward(user, memory, user_tab, item_tab, conv_w, conv_b)
    out = jax.block_until_ready(out)

    ref = reference_forward(user, memory, user_tab, item_tab, conv_w, conv_b)
    assert out.shape == (B, 3 * embedding_dim)
    assert jnp.allclose(out, ref, atol=1e-5, rtol=1e-5), (
        f"max abs diff {jnp.max(jnp.abs(out - ref))}")

    print("KERNEL_OK")
</pallas_src>

<mosaic_0001>
module attributes {stable_mosaic.version = 11 : i64} {
  func.func @_state_repr_vmem_kernel(%arg0: i32, %arg1: memref<8xi32, #tpu.memory_space<smem>>, %arg2: memref<40xi32, #tpu.memory_space<smem>>, %arg3: memref<16x32xf32, #tpu.memory_space<vmem>>, %arg4: memref<33x32xf32, #tpu.memory_space<vmem>>, %arg5: memref<5xf32, #tpu.memory_space<smem>>, %arg6: memref<1xf32, #tpu.memory_space<smem>>, %arg7: memref<8x128xf32, #tpu.memory_space<vmem>>, %arg8: memref<8x32xf32, #tpu.memory_space<vmem>>, %arg9: memref<8x32xf32, #tpu.memory_space<vmem>>) attributes {dimension_semantics = [#tpu.dimension_semantics<parallel>], iteration_bounds = array<i64: 1>, scalar_prefetch = 2 : i64, scratch_operands = 2 : i64, tpu.core_type = #tpu.core_type<tc>, window_params = [{pipeline_mode = #tpu.pipeline_mode<synchronous>, transform_indices = @transform_0, window_bounds = array<i64: 16, 32>}, {pipeline_mode = #tpu.pipeline_mode<synchronous>, transform_indices = @transform_1, window_bounds = array<i64: 33, 32>}, {transform_indices = @transform_2, window_bounds = array<i64: 5>}, {transform_indices = @transform_3, window_bounds = array<i64: 1>}, {transform_indices = @transform_4, window_bounds = array<i64: 8, 128>}]} {
    %c8_i32 = arith.constant 8 : i32
    %0 = arith.muli %arg0, %c8_i32 : i32
    %c0_i32 = arith.constant 0 : i32
    %1 = arith.addi %0, %c0_i32 : i32
    %2 = arith.index_cast %1 : i32 to index
    %3 = memref.load %arg1[%2] : memref<8xi32, #tpu.memory_space<smem>>
    %4 = arith.index_cast %3 : i32 to index
    %c0 = arith.constant 0 : index
    %5 = vector.load %arg3[%4, %c0] : memref<16x32xf32, #tpu.memory_space<vmem>>, vector<1x32xf32>
    %c0_0 = arith.constant 0 : index
    %c0_1 = arith.constant 0 : index
    %6 = vector.load %arg8[%c0_0, %c0_1] : memref<8x32xf32, #tpu.memory_space<vmem>>, vector<1x32xf32>
    tpu.vector_store %arg8[%c0_0, %c0_1], %5 {strides = array<i32>} : memref<8x32xf32, #tpu.memory_space<vmem>>, vector<1x32xf32>,
    %cst = arith.constant 0.000000e+00 : f32
    %7 = vector.broadcast %cst : f32 to vector<1x32xf32>
    %c5_i32 = arith.constant 5 : i32
    %8 = arith.muli %1, %c5_i32 : i32
    %c0_i32_2 = arith.constant 0 : i32
    %9 = arith.addi %8, %c0_i32_2 : i32
    %10 = arith.index_cast %9 : i32 to index
    %11 = memref.load %arg2[%10] : memref<40xi32, #tpu.memory_space<smem>>
    %c0_3 = arith.constant 0 : index
    %12 = memref.load %arg5[%c0_3] : memref<5xf32, #tpu.memory_space<smem>>
    %13 = arith.index_cast %11 : i32 to index
    %c0_4 = arith.constant 0 : index
    %14 = vector.load %arg4[%13, %c0_4] : memref<33x32xf32, #tpu.memory_space<vmem>>, vector<1x32xf32>
    %15 = vector.broadcast %12 : f32 to vector<1x32xf32>
    %16 = arith.mulf %15, %14 : vector<1x32xf32>
    %17 = arith.addf %7, %16 : vector<1x32xf32>
    %c5_i32_5 = arith.constant 5 : i32
    %18 = arith.muli %1, %c5_i32_5 : i32
    %c1_i32 = arith.constant 1 : i32
    %19 = arith.addi %18, %c1_i32 : i32
    %20 = arith.index_cast %19 : i32 to index
    %21 = memref.load %arg2[%20] : memref<40xi32, #tpu.memory_space<smem>>
    %c1 = arith.constant 1 : index
    %22 = memref.load %arg5[%c1] : memref<5xf32, #tpu.memory_space<smem>>
    %23 = arith.index_cast %21 : i32 to index
    %c0_6 = arith.constant 0 : index
    %24 = vector.load %arg4[%23, %c0_6] : memref<33x32xf32, #tpu.memory_space<vmem>>, vector<1x32xf32>
    %25 = vector.broadcast %22 : f32 to vector<1x32xf32>
    %26 = arith.mulf %25, %24 : vector<1x32xf32>
    %27 = arith.addf %17, %26 : vector<1x32xf32>
    %c5_i32_7 = arith.constant 5 : i32
    %28 = arith.muli %1, %c5_i32_7 : i32
    %c2_i32 = arith.constant 2 : i32
    %29 = arith.addi %28, %c2_i32 : i32
    %30 = arith.index_cast %29 : i32 to index
    %31 = memref.load %arg2[%30] : memref<40xi32, #tpu.memory_space<smem>>
    %c2 = arith.constant 2 : index
    %32 = memref.load %arg5[%c2] : memref<5xf32, #tpu.memory_space<smem>>
    %33 = arith.index_cast %31 : i32 to index
    %c0_8 = arith.constant 0 : index
    %34 = vector.load %arg4[%33, %c0_8] : memref<33x32xf32, #tpu.memory_space<vmem>>, vector<1x32xf32>
    %35 = vector.broadcast %32 : f32 to vector<1x32xf32>
    %36 = arith.mulf %35, %34 : vector<1x32xf32>
    %37 = arith.addf %27, %36 : vector<1x32xf32>
    %c5_i32_9 = arith.constant 5 : i32
    %38 = arith.muli %1, %c5_i32_9 : i32
    %c3_i32 = arith.constant 3 : i32
    %39 = arith.addi %38, %c3_i32 : i32
    %40 = arith.index_cast %39 : i32 to index
    %41 = memref.load %arg2[%40] : memref<40xi32, #tpu.memory_space<smem>>
    %c3 = arith.constant 3 : index
    %42 = memref.load %arg5[%c3] : memref<5xf32, #tpu.memory_space<smem>>
    %43 = arith.index_cast %41 : i32 to index
    %c0_10 = arith.constant 0 : index
    %44 = vector.load %arg4[%43, %c0_10] : memref<33x32xf32, #tpu.memory_space<vmem>>, vector<1x32xf32>
    %45 = vector.broadcast %42 : f32 to vector<1x32xf32>
    %46 = arith.mulf %45, %44 : vector<1x32xf32>
    %47 = arith.addf %37, %46 : vector<1x32xf32>
    %c5_i32_11 = arith.constant 5 : i32
    %48 = arith.muli %1, %c5_i32_11 : i32
    %c4_i32 = arith.constant 4 : i32
    %49 = arith.addi %48, %c4_i32 : i32
    %50 = arith.index_cast %49 : i32 to index
    %51 = memref.load %arg2[%50] : memref<40xi32, #tpu.memory_space<smem>>
    %c4 = arith.constant 4 : index
    %52 = memref.load %arg5[%c4] : memref<5xf32, #tpu.memory_space<smem>>
    %53 = arith.index_cast %51 : i32 to index
    %c0_12 = arith.constant 0 : index
    %54 = vector.load %arg4[%53, %c0_12] : memref<33x32xf32, #tpu.memory_space<vmem>>, vector<1x32xf32>
    %55 = vector.broadcast %52 : f32 to vector<1x32xf32>
    %56 = arith.mulf %55, %54 : vector<1x32xf32>
    %57 = arith.addf %47, %56 : vector<1x32xf32>
    %c0_13 = arith.constant 0 : index
    %58 = memref.load %arg6[%c0_13] : memref<1xf32, #tpu.memory_space<smem>>
    %59 = vector.broadcast %58 : f32 to vector<1x32xf32>
    %60 = arith.addf %57, %59 : vector<1x32xf32>
    %c0_14 = arith.constant 0 : index
    %c0_15 = arith.constant 0 : index
    %61 = vector.load %arg9[%c0_14, %c0_15] : memref<8x32xf32, #tpu.memory_space<vmem>>, vector<1x32xf32>
    tpu.vector_store %arg9[%c0_14, %c0_15], %60 {strides = array<i32>} : memref<8x32xf32, #tpu.memory_space<vmem>>, vector<1x32xf32>,
    %c8_i32_16 = arith.constant 8 : i32
    %62 = arith.muli %arg0, %c8_i32_16 : i32
    %c1_i32_17 = arith.constant 1 : i32
    %63 = arith.addi %62, %c1_i32_17 : i32
    %64 = arith.index_cast %63 : i32 to index
    %65 = memref.load %arg1[%64] : memref<8xi32, #tpu.memory_space<smem>>
    %66 = arith.index_cast %65 : i32 to index
    %c0_18 = arith.constant 0 : index
    %67 = vector.load %arg3[%66, %c0_18] : memref<16x32xf32, #tpu.memory_space<vmem>>, vector<1x32xf32>
    %c1_19 = arith.constant 1 : index
    %c0_20 = arith.constant 0 : index
    %68 = vector.load %arg8[%c1_19, %c0_20] : memref<8x32xf32, #tpu.memory_space<vmem>>, vector<1x32xf32>
    tpu.vector_store %arg8[%c1_19, %c0_20], %67 {strides = array<i32>} : memref<8x32xf32, #tpu.memory_space<vmem>>, vector<1x32xf32>,
    %cst_21 = arith.constant 0.000000e+00 : f32
    %69 = vector.broadcast %cst_21 : f32 to vector<1x32xf32>
    %c5_i32_22 = arith.constant 5 : i32
    %70 = arith.muli %63, %c5_i32_22 : i32
    %c0_i32_23 = arith.constant 0 : i32
    %71 = arith.addi %70, %c0_i32_23 : i32
    %72 = arith.index_cast %71 : i32 to index
    %73 = memref.load %arg2[%72] : memref<40xi32, #tpu.memory_space<smem>>
    %c0_24 = arith.constant 0 : index
    %74 = memref.load %arg5[%c0_24] : memref<5xf32, #tpu.memory_space<smem>>
    %75 = arith.index_cast %73 : i32 to index
    %c0_25 = arith.constant 0 : index
    %76 = vector.load %arg4[%75, %c0_25] : memref<33x32xf32, #tpu.memory_space<vmem>>, vector<1x32xf32>
    %77 = vector.broadcast %74 : f32 to vector<1x32xf32>
    %78 = arith.mulf %77, %76 : vector<1x32xf32>
    %79 = arith.addf %69, %78 : vector<1x32xf32>
    %c5_i32_26 = arith.constant 5 : i32
    %80 = arith.muli %63, %c5_i32_26 : i32
    %c1_i32_27 = arith.constant 1 : i32
    %81 = arith.addi %80, %c1_i32_27 : i32
    %82 = arith.index_cast %81 : i32 to index
    %83 = memref.load %arg2[%82] : memref<40xi32, #tpu.memory_space<smem>>
    %c1_28 = arith.constant 1 : index
    %84 = memref.load %arg5[%c1_28] : memref<5xf32, #tpu.memory_space<smem>>
    %85 = arith.index_cast %83 : i32 to index
    %c0_29 = arith.constant 0 : index
    %86 = vector.load %arg4[%85, %c0_29] : memref<33x32xf32, #tpu.memory_space<vmem>>, vector<1x32xf32>
    %87 = vector.broadcast %84 : f32 to vector<1x32xf32>
    %88 = arith.mulf %87, %86 : vector<1x32xf32>
    %89 = arith.addf %79, %88 : vector<1x32xf32>
    %c5_i32_30 = arith.constant 5 : i32
    %90 = arith.muli %63, %c5_i32_30 : i32
    %c2_i32_31 = arith.constant 2 : i32
    %91 = arith.addi %90, %c2_i32_31 : i32
    %92 = arith.index_cast %91 : i32 to index
    %93 = memref.load %arg2[%92] : memref<40xi32, #tpu.memory_space<smem>>
    %c2_32 = arith.constant 2 : index
    %94 = memref.load %arg5[%c2_32] : memref<5xf32, #tpu.memory_space<smem>>
    %95 = arith.index_cast %93 : i32 to index
    %c0_33 = arith.constant 0 : index
    %96 = vector.load %arg4[%95, %c0_33] : memref<33x32xf32, #tpu.memory_space<vmem>>, vector<1x32xf32>
    %97 = vector.broadcast %94 : f32 to vector<1x32xf32>
    %98 = arith.mulf %97, %96 : vector<1x32xf32>
    %99 = arith.addf %89, %98 : vector<1x32xf32>
    %c5_i32_34 = arith.constant 5 : i32
    %100 = arith.muli %63, %c5_i32_34 : i32
    %c3_i32_35 = arith.constant 3 : i32
    %101 = arith.addi %100, %c3_i32_35 : i32
    %102 = arith.index_cast %101 : i32 to index
    %103 = memref.load %arg2[%102] : memref<40xi32, #tpu.memory_space<smem>>
    %c3_36 = arith.constant 3 : index
    %104 = memref.load %arg5[%c3_36] : memref<5xf32, #tpu.memory_space<smem>>
    %105 = arith.index_cast %103 : i32 to index
    %c0_37 = arith.constant 0 : index
    %106 = vector.load %arg4[%105, %c0_37] : memref<33x32xf32, #tpu.memory_space<vmem>>, vector<1x32xf32>
    %107 = vector.broadcast %104 : f32 to vector<1x32xf32>
    %108 = arith.mulf %107, %106 : vector<1x32xf32>
    %109 = arith.addf %99, %108 : vector<1x32xf32>
    %c5_i32_38 = arith.constant 5 : i32
    %110 = arith.muli %63, %c5_i32_38 : i32
    %c4_i32_39 = arith.constant 4 : i32
    %111 = arith.addi %110, %c4_i32_39 : i32
    %112 = arith.index_cast %111 : i32 to index
    %113 = memref.load %arg2[%112] : memref<40xi32, #tpu.memory_space<smem>>
    %c4_40 = arith.constant 4 : index
    %114 = memref.load %arg5[%c4_40] : memref<5xf32, #tpu.memory_space<smem>>
    %115 = arith.index_cast %113 : i32 to index
    %c0_41 = arith.constant 0 : index
    %116 = vector.load %arg4[%115, %c0_41] : memref<33x32xf32, #tpu.memory_space<vmem>>, vector<1x32xf32>
    %117 = vector.broadcast %114 : f32 to vector<1x32xf32>
    %118 = arith.mulf %117, %116 : vector<1x32xf32>
    %119 = arith.addf %109, %118 : vector<1x32xf32>
    %c0_42 = arith.constant 0 : index
    %120 = memref.load %arg6[%c0_42] : memref<1xf32, #tpu.memory_space<smem>>
    %121 = vector.broadcast %120 : f32 to vector<1x32xf32>
    %122 = arith.addf %119, %121 : vector<1x32xf32>
    %c1_43 = arith.constant 1 : index
    %c0_44 = arith.constant 0 : index
    %123 = vector.load %arg9[%c1_43, %c0_44] : memref<8x32xf32, #tpu.memory_space<vmem>>, vector<1x32xf32>
    tpu.vector_store %arg9[%c1_43, %c0_44], %122 {strides = array<i32>} : memref<8x32xf32, #tpu.memory_space<vmem>>, vector<1x32xf32>,
    %c8_i32_45 = arith.constant 8 : i32
    %124 = arith.muli %arg0, %c8_i32_45 : i32
    %c2_i32_46 = arith.constant 2 : i32
    %125 = arith.addi %124, %c2_i32_46 : i32
    %126 = arith.index_cast %125 : i32 to index
    %127 = memref.load %arg1[%126] : memref<8xi32, #tpu.memory_space<smem>>
    %128 = arith.index_cast %127 : i32 to index
    %c0_47 = arith.constant 0 : index
    %129 = vector.load %arg3[%128, %c0_47] : memref<16x32xf32, #tpu.memory_space<vmem>>, vector<1x32xf32>
    %c2_48 = arith.constant 2 : index
    %c0_49 = arith.constant 0 : index
    %130 = vector.load %arg8[%c2_48, %c0_49] : memref<8x32xf32, #tpu.memory_space<vmem>>, vector<1x32xf32>
    tpu.vector_store %arg8[%c2_48, %c0_49], %129 {strides = array<i32>} : memref<8x32xf32, #tpu.memory_space<vmem>>, vector<1x32xf32>,
    %cst_50 = arith.constant 0.000000e+00 : f32
    %131 = vector.broadcast %cst_50 : f32 to vector<1x32xf32>
    %c5_i32_51 = arith.constant 5 : i32
    %132 = arith.muli %125, %c5_i32_51 : i32
    %c0_i32_52 = arith.constant 0 : i32
    %133 = arith.addi %132, %c0_i32_52 : i32
    %134 = arith.index_cast %133 : i32 to index
    %135 = memref.load %arg2[%134] : memref<40xi32, #tpu.memory_space<smem>>
    %c0_53 = arith.constant 0 : index
    %136 = memref.load %arg5[%c0_53] : memref<5xf32, #tpu.memory_space<smem>>
    %137 = arith.index_cast %135 : i32 to index
    %c0_54 = arith.constant 0 : index
    %138 = vector.load %arg4[%137, %c0_54] : memref<33x32xf32, #tpu.memory_space<vmem>>, vector<1x32xf32>
    %139 = vector.broadcast %136 : f32 to vector<1x32xf32>
    %140 = arith.mulf %139, %138 : vector<1x32xf32>
    %141 = arith.addf %131, %140 : vector<1x32xf32>
    %c5_i32_55 = arith.constant 5 : i32
    %142 = arith.muli %125, %c5_i32_55 : i32
    %c1_i32_56 = arith.constant 1 : i32
    %143 = arith.addi %142, %c1_i32_56 : i32
    %144 = arith.index_cast %143 : i32 to index
    %145 = memref.load %arg2[%144] : memref<40xi32, #tpu.memory_space<smem>>
    %c1_57 = arith.constant 1 : index
    %146 = memref.load %arg5[%c1_57] : memref<5xf32, #tpu.memory_space<smem>>
    %147 = arith.index_cast %145 : i32 to index
    %c0_58 = arith.constant 0 : index
    %148 = vector.load %arg4[%147, %c0_58] : memref<33x32xf32, #tpu.memory_space<vmem>>, vector<1x32xf32>
    %149 = vector.broadcast %146 : f32 to vector<1x32xf32>
    %150 = arith.mulf %149, %148 : vector<1x32xf32>
    %151 = arith.addf %141, %150 : vector<1x32xf32>
    %c5_i32_59 = arith.constant 5 : i32
    %152 = arith.muli %125, %c5_i32_59 : i32
    %c2_i32_60 = arith.constant 2 : i32
    %153 = arith.addi %152, %c2_i32_60 : i32
    %154 = arith.index_cast %153 : i32 to index
    %155 = memref.load %arg2[%154] : memref<40xi32, #tpu.memory_space<smem>>
    %c2_61 = arith.constant 2 : index
    %156 = memref.load %arg5[%c2_61] : memref<5xf32, #tpu.memory_space<smem>>
    %157 = arith.index_cast %155 : i32 to index
    %c0_62 = arith.constant 0 : index
    %158 = vector.load %arg4[%157, %c0_62] : memref<33x32xf32, #tpu.memory_space<vmem>>, vector<1x32xf32>
    %159 = vector.broadcast %156 : f32 to vector<1x32xf32>
    %160 = arith.mulf %159, %158 : vector<1x32xf32>
    %161 = arith.addf %151, %160 : vector<1x32xf32>
    %c5_i32_63 = arith.constant 5 : i32
    %162 = arith.muli %125, %c5_i32_63 : i32
    %c3_i32_64 = arith.constant 3 : i32
    %163 = arith.addi %162, %c3_i32_64 : i32
    %164 = arith.index_cast %163 : i32 to index
    %165 = memref.load %arg2[%164] : memref<40xi32, #tpu.memory_space<smem>>
    %c3_65 = arith.constant 3 : index
    %166 = memref.load %arg5[%c3_65] : memref<5xf32, #tpu.memory_space<smem>>
    %167 = arith.index_cast %165 : i32 to index
    %c0_66 = arith.constant 0 : index
    %168 = vector.load %arg4[%167, %c0_66] : memref<33x32xf32, #tpu.memory_space<vmem>>, vector<1x32xf32>
    %169 = vector.broadcast %166 : f32 to vector<1x32xf32>
    %170 = arith.mulf %169, %168 : vector<1x32xf32>
    %171 = arith.addf %161, %170 : vector<1x32xf32>
    %c5_i32_67 = arith.constant 5 : i32
    %172 = arith.muli %125, %c5_i32_67 : i32
    %c4_i32_68 = arith.constant 4 : i32
    %173 = arith.addi %172, %c4_i32_68 : i32
    %174 = arith.index_cast %173 : i32 to index
    %175 = memref.load %arg2[%174] : memref<40xi32, #tpu.memory_space<smem>>
    %c4_69 = arith.constant 4 : index
    %176 = memref.load %arg5[%c4_69] : memref<5xf32, #tpu.memory_space<smem>>
    %177 = arith.index_cast %175 : i32 to index
    %c0_70 = arith.constant 0 : index
    %178 = vector.load %arg4[%177, %c0_70] : memref<33x32xf32, #tpu.memory_space<vmem>>, vector<1x32xf32>
    %179 = vector.broadcast %176 : f32 to vector<1x32xf32>
    %180 = arith.mulf %179, %178 : vector<1x32xf32>
    %181 = arith.addf %171, %180 : vector<1x32xf32>
    %c0_71 = arith.constant 0 : index
    %182 = memref.load %arg6[%c0_71] : memref<1xf32, #tpu.memory_space<smem>>
    %183 = vector.broadcast %182 : f32 to vector<1x32xf32>
    %184 = arith.addf %181, %183 : vector<1x32xf32>
    %c2_72 = arith.constant 2 : index
    %c0_73 = arith.constant 0 : index
    %185 = vector.load %arg9[%c2_72, %c0_73] : memref<8x32xf32, #tpu.memory_space<vmem>>, vector<1x32xf32>
    tpu.vector_store %arg9[%c2_72, %c0_73], %184 {strides = array<i32>} : memref<8x32xf32, #tpu.memory_space<vmem>>, vector<1x32xf32>,
    %c8_i32_74 = arith.constant 8 : i32
    %186 = arith.muli %arg0, %c8_i32_74 : i32
    %c3_i32_75 = arith.constant 3 : i32
    %187 = arith.addi %186, %c3_i32_75 : i32
    %188 = arith.index_cast %187 : i32 to index
    %189 = memref.load %arg1[%188] : memref<8xi32, #tpu.memory_space<smem>>
    %190 = arith.index_cast %189 : i32 to index
    %c0_76 = arith.constant 0 : index
    %191 = vector.load %arg3[%190, %c0_76] : memref<16x32xf32, #tpu.memory_space<vmem>>, vector<1x32xf32>
    %c3_77 = arith.constant 3 : index
    %c0_78 = arith.constant 0 : index
    %192 = vector.load %arg8[%c3_77, %c0_78] : memref<8x32xf32, #tpu.memory_space<vmem>>, vector<1x32xf32>
    tpu.vector_store %arg8[%c3_77, %c0_78], %191 {strides = array<i32>} : memref<8x32xf32, #tpu.memory_space<vmem>>, vector<1x32xf32>,
    %cst_79 = arith.constant 0.000000e+00 : f32
    %193 = vector.broadcast %cst_79 : f32 to vector<1x32xf32>
    %c5_i32_80 = arith.constant 5 : i32
    %194 = arith.muli %187, %c5_i32_80 : i32
    %c0_i32_81 = arith.constant 0 : i32
    %195 = arith.addi %194, %c0_i32_81 : i32
    %196 = arith.index_cast %195 : i32 to index
    %197 = memref.load %arg2[%196] : memref<40xi32, #tpu.memory_space<smem>>
    %c0_82 = arith.constant 0 : index
    %198 = memref.load %arg5[%c0_82] : memref<5xf32, #tpu.memory_space<smem>>
    %199 = arith.index_cast %197 : i32 to index
    %c0_83 = arith.constant 0 : index
    %200 = vector.load %arg4[%199, %c0_83] : memref<33x32xf32, #tpu.memory_space<vmem>>, vector<1x32xf32>
    %201 = vector.broadcast %198 : f32 to vector<1x32xf32>
    %202 = arith.mulf %201, %200 : vector<1x32xf32>
    %203 = arith.addf %193, %202 : vector<1x32xf32>
    %c5_i32_84 = arith.constant 5 : i32
    %204 = arith.muli %187, %c5_i32_84 : i32
    %c1_i32_85 = arith.constant 1 : i32
    %205 = arith.addi %204, %c1_i32_85 : i32
    %206 = arith.index_cast %205 : i32 to index
    %207 = memref.load %arg2[%206] : memref<40xi32, #tpu.memory_space<smem>>
    %c1_86 = arith.constant 1 : index
    %208 = memref.load %arg5[%c1_86] : memref<5xf32, #tpu.memory_space<smem>>
    %209 = arith.index_cast %207 : i32 to index
    %c0_87 = arith.constant 0 : index
    %210 = vector.load %arg4[%209, %c0_87] : memref<33x32xf32, #tpu.memory_space<vmem>>, vector<1x32xf32>
    %211 = vector.broadcast %208 : f32 to vector<1x32xf32>
    %212 = arith.mulf %211, %210 : vector<1x32xf32>
    %213 = arith.addf %203, %212 : vector<1x32xf32>
    %c5_i32_88 = arith.constant 5 : i32
    %214 = arith.muli %187, %c5_i32_88 : i32
    %c2_i32_89 = arith.constant 2 : i32
    %215 = arith.addi %214, %c2_i32_89 : i32
    %216 = arith.index_cast %215 : i32 to index
    %217 = memref.load %arg2[%216] : memref<40xi32, #tpu.memory_space<smem>>
    %c2_90 = arith.constant 2 : index
    %218 = memref.load %arg5[%c2_90] : memref<5xf32, #tpu.memory_space<smem>>
    %219 = arith.index_cast %217 : i32 to index
    %c0_91 = arith.constant 0 : index
    %220 = vector.load %arg4[%219, %c0_91] : memref<33x32xf32, #tpu.memory_space<vmem>>, vector<1x32xf32>
    %221 = vector.broadcast %218 : f32 to vector<1x32xf32>
    %222 = arith.mulf %221, %220 : vector<1x32xf32>
    %223 = arith.addf %213, %222 : vector<1x32xf32>
    %c5_i32_92 = arith.constant 5 : i32
    %224 = arith.muli %187, %c5_i32_92 : i32
    %c3_i32_93 = arith.constant 3 : i32
    %225 = arith.addi %224, %c3_i32_93 : i32
    %226 = arith.index_cast %225 : i32 to index
    %227 = memref.load %arg2[%226] : memref<40xi32, #tpu.memory_space<smem>>
    %c3_94 = arith.constant 3 : index
    %228 = memref.load %arg5[%c3_94] : memref<5xf32, #tpu.memory_space<smem>>
    %229 = arith.index_cast %227 : i32 to index
    %c0_95 = arith.constant 0 : index
    %230 = vector.load %arg4[%229, %c0_95] : memref<33x32xf32, #tpu.memory_space<vmem>>, vector<1x32xf32>
    %231 = vector.broadcast %228 : f32 to vector<1x32xf32>
    %232 = arith.mulf %231, %230 : vector<1x32xf32>
    %233 = arith.addf %223, %232 : vector<1x32xf32>
    %c5_i32_96 = arith.constant 5 : i32
    %234 = arith.muli %187, %c5_i32_96 : i32
    %c4_i32_97 = arith.constant 4 : i32
    %235 = arith.addi %234, %c4_i32_97 : i32
    %236 = arith.index_cast %235 : i32 to index
    %237 = memref.load %arg2[%236] : memref<40xi32, #tpu.memory_space<smem>>
    %c4_98 = arith.constant 4 : index
    %238 = memref.load %arg5[%c4_98] : memref<5xf32, #tpu.memory_space<smem>>
    %239 = arith.index_cast %237 : i32 to index
    %c0_99 = arith.constant 0 : index
    %240 = vector.load %arg4[%239, %c0_99] : memref<33x32xf32, #tpu.memory_space<vmem>>, vector<1x32xf32>
    %241 = vector.broadcast %238 : f32 to vector<1x32xf32>
    %242 = arith.mulf %241, %240 : vector<1x32xf32>
    %243 = arith.addf %233, %242 : vector<1x32xf32>
    %c0_100 = arith.constant 0 : index
    %244 = memref.load %arg6[%c0_100] : memref<1xf32, #tpu.memory_space<smem>>
    %245 = vector.broadcast %244 : f32 to vector<1x32xf32>
    %246 = arith.addf %243, %245 : vector<1x32xf32>
    %c3_101 = arith.constant 3 : index
    %c0_102 = arith.constant 0 : index
    %247 = vector.load %arg9[%c3_101, %c0_102] : memref<8x32xf32, #tpu.memory_space<vmem>>, vector<1x32xf32>
    tpu.vector_store %arg9[%c3_101, %c0_102], %246 {strides = array<i32>} : memref<8x32xf32, #tpu.memory_space<vmem>>, vector<1x32xf32>,
    %c8_i32_103 = arith.constant 8 : i32
    %248 = arith.muli %arg0, %c8_i32_103 : i32
    %c4_i32_104 = arith.constant 4 : i32
    %249 = arith.addi %248, %c4_i32_104 : i32
    %250 = arith.index_cast %249 : i32 to index
    %251 = memref.load %arg1[%250] : memref<8xi32, #tpu.memory_space<smem>>
    %252 = arith.index_cast %251 : i32 to index
    %c0_105 = arith.constant 0 : index
    %253 = vector.load %arg3[%252, %c0_105] : memref<16x32xf32, #tpu.memory_space<vmem>>, vector<1x32xf32>
    %c4_106 = arith.constant 4 : index
    %c0_107 = arith.constant 0 : index
    %254 = vector.load %arg8[%c4_106, %c0_107] : memref<8x32xf32, #tpu.memory_space<vmem>>, vector<1x32xf32>
    tpu.vector_store %arg8[%c4_106, %c0_107], %253 {strides = array<i32>} : memref<8x32xf32, #tpu.memory_space<vmem>>, vector<1x32xf32>,
    %cst_108 = arith.constant 0.000000e+00 : f32
    %255 = vector.broadcast %cst_108 : f32 to vector<1x32xf32>
    %c5_i32_109 = arith.constant 5 : i32
    %256 = arith.muli %249, %c5_i32_109 : i32
    %c0_i32_110 = arith.constant 0 : i32
    %257 = arith.addi %256, %c0_i32_110 : i32
    %258 = arith.index_cast %257 : i32 to index
    %259 = memref.load %arg2[%258] : memref<40xi32, #tpu.memory_space<smem>>
    %c0_111 = arith.constant 0 : index
    %260 = memref.load %arg5[%c0_111] : memref<5xf32, #tpu.memory_space<smem>>
    %261 = arith.index_cast %259 : i32 to index
    %c0_112 = arith.constant 0 : index
    %262 = vector.load %arg4[%261, %c0_112] : memref<33x32xf32, #tpu.memory_space<vmem>>, vector<1x32xf32>
    %263 = vector.broadcast %260 : f32 to vector<1x32xf32>
    %264 = arith.mulf %263, %262 : vector<1x32xf32>
    %265 = arith.addf %255, %264 : vector<1x32xf32>
    %c5_i32_113 = arith.constant 5 : i32
    %266 = arith.muli %249, %c5_i32_113 : i32
    %c1_i32_114 = arith.constant 1 : i32
    %267 = arith.addi %266, %c1_i32_114 : i32
    %268 = arith.index_cast %267 : i32 to index
    %269 = memref.load %arg2[%268] : memref<40xi32, #tpu.memory_space<smem>>
    %c1_115 = arith.constant 1 : index
    %270 = memref.load %arg5[%c1_115] : memref<5xf32, #tpu.memory_space<smem>>
    %271 = arith.index_cast %269 : i32 to index
    %c0_116 = arith.constant 0 : index
    %272 = vector.load %arg4[%271, %c0_116] : memref<33x32xf32, #tpu.memory_space<vmem>>, vector<1x32xf32>
    %273 = vector.broadcast %270 : f32 to vector<1x32xf32>
    %274 = arith.mulf %273, %272 : vector<1x32xf32>
    %275 = arith.addf %265, %274 : vector<1x32xf32>
    %c5_i32_117 = arith.constant 5 : i32
    %276 = arith.muli %249, %c5_i32_117 : i32
    %c2_i32_118 = arith.constant 2 : i32
    %277 = arith.addi %276, %c2_i32_118 : i32
    %278 = arith.index_cast %277 : i32 to index
    %279 = memref.load %arg2[%278] : memref<40xi32, #tpu.memory_space<smem>>
    %c2_119 = arith.constant 2 : index
    %280 = memref.load %arg5[%c2_119] : memref<5xf32, #tpu.memory_space<smem>>
    %281 = arith.index_cast %279 : i32 to index
    %c0_120 = arith.constant 0 : index
    %282 = vector.load %arg4[%281, %c0_120] : memref<33x32xf32, #tpu.memory_space<vmem>>, vector<1x32xf32>
    %283 = vector.broadcast %280 : f32 to vector<1x32xf32>
    %284 = arith.mulf %283, %282 : vector<1x32xf32>
    %285 = arith.addf %275, %284 : vector<1x32xf32>
    %c5_i32_121 = arith.constant 5 : i32
    %286 = arith.muli %249, %c5_i32_121 : i32
    %c3_i32_122 = arith.constant 3 : i32
    %287 = arith.addi %286, %c3_i32_122 : i32
    %288 = arith.index_cast %287 : i32 to index
    %289 = memref.load %arg2[%288] : memref<40xi32, #tpu.memory_space<smem>>
    %c3_123 = arith.constant 3 : index
    %290 = memref.load %arg5[%c3_123] : memref<5xf32, #tpu.memory_space<smem>>
    %291 = arith.index_cast %289 : i32 to index
    %c0_124 = arith.constant 0 : index
    %292 = vector.load %arg4[%291, %c0_124] : memref<33x32xf32, #tpu.memory_space<vmem>>, vector<1x32xf32>
    %293 = vector.broadcast %290 : f32 to vector<1x32xf32>
    %294 = arith.mulf %293, %292 : vector<1x32xf32>
    %295 = arith.addf %285, %294 : vector<1x32xf32>
    %c5_i32_125 = arith.constant 5 : i32
    %296 = arith.muli %249, %c5_i32_125 : i32
    %c4_i32_126 = arith.constant 4 : i32
    %297 = arith.addi %296, %c4_i32_126 : i32
    %298 = arith.index_cast %297 : i32 to index
    %299 = memref.load %arg2[%298] : memref<40xi32, #tpu.memory_space<smem>>
    %c4_127 = arith.constant 4 : index
    %300 = memref.load %arg5[%c4_127] : memref<5xf32, #tpu.memory_space<smem>>
    %301 = arith.index_cast %299 : i32 to index
    %c0_128 = arith.constant 0 : index
    %302 = vector.load %arg4[%301, %c0_128] : memref<33x32xf32, #tpu.memory_space<vmem>>, vector<1x32xf32>
    %303 = vector.broadcast %300 : f32 to vector<1x32xf32>
    %304 = arith.mulf %303, %302 : vector<1x32xf32>
    %305 = arith.addf %295, %304 : vector<1x32xf32>
    %c0_129 = arith.constant 0 : index
    %306 = memref.load %arg6[%c0_129] : memref<1xf32, #tpu.memory_space<smem>>
    %307 = vector.broadcast %306 : f32 to vector<1x32xf32>
    %308 = arith.addf %305, %307 : vector<1x32xf32>
    %c4_130 = arith.constant 4 : index
    %c0_131 = arith.constant 0 : index
    %309 = vector.load %arg9[%c4_130, %c0_131] : memref<8x32xf32, #tpu.memory_space<vmem>>, vector<1x32xf32>
    tpu.vector_store %arg9[%c4_130, %c0_131], %308 {strides = array<i32>} : memref<8x32xf32, #tpu.memory_space<vmem>>, vector<1x32xf32>,
    %c8_i32_132 = arith.constant 8 : i32
    %310 = arith.muli %arg0, %c8_i32_132 : i32
    %c5_i32_133 = arith.constant 5 : i32
    %311 = arith.addi %310, %c5_i32_133 : i32
    %312 = arith.index_cast %311 : i32 to index
    %313 = memref.load %arg1[%312] : memref<8xi32, #tpu.memory_space<smem>>
    %314 = arith.index_cast %313 : i32 to index
    %c0_134 = arith.constant 0 : index
    %315 = vector.load %arg3[%314, %c0_134] : memref<16x32xf32, #tpu.memory_space<vmem>>, vector<1x32xf32>
    %c5 = arith.constant 5 : index
    %c0_135 = arith.constant 0 : index
    %316 = vector.load %arg8[%c5, %c0_135] : memref<8x32xf32, #tpu.memory_space<vmem>>, vector<1x32xf32>
    tpu.vector_store %arg8[%c5, %c0_135], %315 {strides = array<i32>} : memref<8x32xf32, #tpu.memory_space<vmem>>, vector<1x32xf32>,
    %cst_136 = arith.constant 0.000000e+00 : f32
    %317 = vector.broadcast %cst_136 : f32 to vector<1x32xf32>
    %c5_i32_137 = arith.constant 5 : i32
    %318 = arith.muli %311, %c5_i32_137 : i32
    %c0_i32_138 = arith.constant 0 : i32
    %319 = arith.addi %318, %c0_i32_138 : i32
    %320 = arith.index_cast %319 : i32 to index
    %321 = memref.load %arg2[%320] : memref<40xi32, #tpu.memory_space<smem>>
    %c0_139 = arith.constant 0 : index
    %322 = memref.load %arg5[%c0_139] : memref<5xf32, #tpu.memory_space<smem>>
    %323 = arith.index_cast %321 : i32 to index
    %c0_140 = arith.constant 0 : index
    %324 = vector.load %arg4[%323, %c0_140] : memref<33x32xf32, #tpu.memory_space<vmem>>, vector<1x32xf32>
    %325 = vector.broadcast %322 : f32 to vector<1x32xf32>
    %326 = arith.mulf %325, %324 : vector<1x32xf32>
    %327 = arith.addf %317, %326 : vector<1x32xf32>
    %c5_i32_141 = arith.constant 5 : i32
    %328 = arith.muli %311, %c5_i32_141 : i32
    %c1_i32_142 = arith.constant 1 : i32
    %329 = arith.addi %328, %c1_i32_142 : i32
    %330 = arith.index_cast %329 : i32 to index
    %331 = memref.load %arg2[%330] : memref<40xi32, #tpu.memory_space<smem>>
    %c1_143 = arith.constant 1 : index
    %332 = memref.load %arg5[%c1_143] : memref<5xf32, #tpu.memory_space<smem>>
    %333 = arith.index_cast %331 : i32 to index
    %c0_144 = arith.constant 0 : index
    %334 = vector.load %arg4[%333, %c0_144] : memref<33x32xf32, #tpu.memory_space<vmem>>, vector<1x32xf32>
    %335 = vector.broadcast %332 : f32 to vector<1x32xf32>
    %336 = arith.mulf %335, %334 : vector<1x32xf32>
    %337 = arith.addf %327, %336 : vector<1x32xf32>
    %c5_i32_145 = arith.constant 5 : i32
    %338 = arith.muli %311, %c5_i32_145 : i32
    %c2_i32_146 = arith.constant 2 : i32
    %339 = arith.addi %338, %c2_i32_146 : i32
    %340 = arith.index_cast %339 : i32 to index
    %341 = memref.load %arg2[%340] : memref<40xi32, #tpu.memory_space<smem>>
    %c2_147 = arith.constant 2 : index
    %342 = memref.load %arg5[%c2_147] : memref<5xf32, #tpu.memory_space<smem>>
    %343 = arith.index_cast %341 : i32 to index
    %c0_148 = arith.constant 0 : index
    %344 = vector.load %arg4[%343, %c0_148] : memref<33x32xf32, #tpu.memory_space<vmem>>, vector<1x32xf32>
    %345 = vector.broadcast %342 : f32 to vector<1x32xf32>
    %346 = arith.mulf %345, %344 : vector<1x32xf32>
    %347 = arith.addf %337, %346 : vector<1x32xf32>
    %c5_i32_149 = arith.constant 5 : i32
    %348 = arith.muli %311, %c5_i32_149 : i32
    %c3_i32_150 = arith.constant 3 : i32
    %349 = arith.addi %348, %c3_i32_150 : i32
    %350 = arith.index_cast %349 : i32 to index
    %351 = memref.load %arg2[%350] : memref<40xi32, #tpu.memory_space<smem>>
    %c3_151 = arith.constant 3 : index
    %352 = memref.load %arg5[%c3_151] : memref<5xf32, #tpu.memory_space<smem>>
    %353 = arith.index_cast %351 : i32 to index
    %c0_152 = arith.constant 0 : index
    %354 = vector.load %arg4[%353, %c0_152] : memref<33x32xf32, #tpu.memory_space<vmem>>, vector<1x32xf32>
    %355 = vector.broadcast %352 : f32 to vector<1x32xf32>
    %356 = arith.mulf %355, %354 : vector<1x32xf32>
    %357 = arith.addf %347, %356 : vector<1x32xf32>
    %c5_i32_153 = arith.constant 5 : i32
    %358 = arith.muli %311, %c5_i32_153 : i32
    %c4_i32_154 = arith.constant 4 : i32
    %359 = arith.addi %358, %c4_i32_154 : i32
    %360 = arith.index_cast %359 : i32 to index
    %361 = memref.load %arg2[%360] : memref<40xi32, #tpu.memory_space<smem>>
    %c4_155 = arith.constant 4 : index
    %362 = memref.load %arg5[%c4_155] : memref<5xf32, #tpu.memory_space<smem>>
    %363 = arith.index_cast %361 : i32 to index
    %c0_156 = arith.constant 0 : index
    %364 = vector.load %arg4[%363, %c0_156] : memref<33x32xf32, #tpu.memory_space<vmem>>, vector<1x32xf32>
    %365 = vector.broadcast %362 : f32 to vector<1x32xf32>
    %366 = arith.mulf %365, %364 : vector<1x32xf32>
    %367 = arith.addf %357, %366 : vector<1x32xf32>
    %c0_157 = arith.constant 0 : index
    %368 = memref.load %arg6[%c0_157] : memref<1xf32, #tpu.memory_space<smem>>
    %369 = vector.broadcast %368 : f32 to vector<1x32xf32>
    %370 = arith.addf %367, %369 : vector<1x32xf32>
    %c5_158 = arith.constant 5 : index
    %c0_159 = arith.constant 0 : index
    %371 = vector.load %arg9[%c5_158, %c0_159] : memref<8x32xf32, #tpu.memory_space<vmem>>, vector<1x32xf32>
    tpu.vector_store %arg9[%c5_158, %c0_159], %370 {strides = array<i32>} : memref<8x32xf32, #tpu.memory_space<vmem>>, vector<1x32xf32>,
    %c8_i32_160 = arith.constant 8 : i32
    %372 = arith.muli %arg0, %c8_i32_160 : i32
    %c6_i32 = arith.constant 6 : i32
    %373 = arith.addi %372, %c6_i32 : i32
    %374 = arith.index_cast %373 : i32 to index
    %375 = memref.load %arg1[%374] : memref<8xi32, #tpu.memory_space<smem>>
    %376 = arith.index_cast %375 : i32 to index
    %c0_161 = arith.constant 0 : index
    %377 = vector.load %arg3[%376, %c0_161] : memref<16x32xf32, #tpu.memory_space<vmem>>, vector<1x32xf32>
    %c6 = arith.constant 6 : index
    %c0_162 = arith.constant 0 : index
    %378 = vector.load %arg8[%c6, %c0_162] : memref<8x32xf32, #tpu.memory_space<vmem>>, vector<1x32xf32>
    tpu.vector_store %arg8[%c6, %c0_162], %377 {strides = array<i32>} : memref<8x32xf32, #tpu.memory_space<vmem>>, vector<1x32xf32>,
    %cst_163 = arith.constant 0.000000e+00 : f32
    %379 = vector.broadcast %cst_163 : f32 to vector<1x32xf32>
    %c5_i32_164 = arith.constant 5 : i32
    %380 = arith.muli %373, %c5_i32_164 : i32
    %c0_i32_165 = arith.constant 0 : i32
    %381 = arith.addi %380, %c0_i32_165 : i32
    %382 = arith.index_cast %381 : i32 to index
    %383 = memref.load %arg2[%382] : memref<40xi32, #tpu.memory_space<smem>>
    %c0_166 = arith.constant 0 : index
    %384 = memref.load %arg5[%c0_166] : memref<5xf32, #tpu.memory_space<smem>>
    %385 = arith.index_cast %383 : i32 to index
    %c0_167 = arith.constant 0 : index
    %386 = vector.load %arg4[%385, %c0_167] : memref<33x32xf32, #tpu.memory_space<vmem>>, vector<1x32xf32>
    %387 = vector.broadcast %384 : f32 to vector<1x32xf32>
    %388 = arith.mulf %387, %386 : vector<1x32xf32>
    %389 = arith.addf %379, %388 : vector<1x32xf32>
    %c5_i32_168 = arith.constant 5 : i32
    %390 = arith.muli %373, %c5_i32_168 : i32
    %c1_i32_169 = arith.constant 1 : i32
    %391 = arith.addi %390, %c1_i32_169 : i32
    %392 = arith.index_cast %391 : i32 to index
    %393 = memref.load %arg2[%392] : memref<40xi32, #tpu.memory_space<smem>>
    %c1_170 = arith.constant 1 : index
    %394 = memref.load %arg5[%c1_170] : memref<5xf32, #tpu.memory_space<smem>>
    %395 = arith.index_cast %393 : i32 to index
    %c0_171 = arith.constant 0 : index
    %396 = vector.load %arg4[%395, %c0_171] : memref<33x32xf32, #tpu.memory_space<vmem>>, vector<1x32xf32>
    %397 = vector.broadcast %394 : f32 to vector<1x32xf32>
    %398 = arith.mulf %397, %396 : vector<1x32xf32>
    %399 = arith.addf %389, %398 : vector<1x32xf32>
    %c5_i32_172 = arith.constant 5 : i32
    %400 = arith.muli %373, %c5_i32_172 : i32
    %c2_i32_173 = arith.constant 2 : i32
    %401 = arith.addi %400, %c2_i32_173 : i32
    %402 = arith.index_cast %401 : i32 to index
    %403 = memref.load %arg2[%402] : memref<40xi32, #tpu.memory_space<smem>>
    %c2_174 = arith.constant 2 : index
    %404 = memref.load %arg5[%c2_174] : memref<5xf32, #tpu.memory_space<smem>>
    %405 = arith.index_cast %403 : i32 to index
    %c0_175 = arith.constant 0 : index
    %406 = vector.load %arg4[%405, %c0_175] : memref<33x32xf32, #tpu.memory_space<vmem>>, vector<1x32xf32>
    %407 = vector.broadcast %404 : f32 to vector<1x32xf32>
    %408 = arith.mulf %407, %406 : vector<1x32xf32>
    %409 = arith.addf %399, %408 : vector<1x32xf32>
    %c5_i32_176 = arith.constant 5 : i32
    %410 = arith.muli %373, %c5_i32_176 : i32
    %c3_i32_177 = arith.constant 3 : i32
    %411 = arith.addi %410, %c3_i32_177 : i32
    %412 = arith.index_cast %411 : i32 to index
    %413 = memref.load %arg2[%412] : memref<40xi32, #tpu.memory_space<smem>>
    %c3_178 = arith.constant 3 : index
    %414 = memref.load %arg5[%c3_178] : memref<5xf32, #tpu.memory_space<smem>>
    %415 = arith.index_cast %413 : i32 to index
    %c0_179 = arith.constant 0 : index
    %416 = vector.load %arg4[%415, %c0_179] : memref<33x32xf32, #tpu.memory_space<vmem>>, vector<1x32xf32>
    %417 = vector.broadcast %414 : f32 to vector<1x32xf32>
    %418 = arith.mulf %417, %416 : vector<1x32xf32>
    %419 = arith.addf %409, %418 : vector<1x32xf32>
    %c5_i32_180 = arith.constant 5 : i32
    %420 = arith.muli %373, %c5_i32_180 : i32
    %c4_i32_181 = arith.constant 4 : i32
    %421 = arith.addi %420, %c4_i32_181 : i32
    %422 = arith.index_cast %421 : i32 to index
    %423 = memref.load %arg2[%422] : memref<40xi32, #tpu.memory_space<smem>>
    %c4_182 = arith.constant 4 : index
    %424 = memref.load %arg5[%c4_182] : memref<5xf32, #tpu.memory_space<smem>>
    %425 = arith.index_cast %423 : i32 to index
    %c0_183 = arith.constant 0 : index
    %426 = vector.load %arg4[%425, %c0_183] : memref<33x32xf32, #tpu.memory_space<vmem>>, vector<1x32xf32>
    %427 = vector.broadcast %424 : f32 to vector<1x32xf32>
    %428 = arith.mulf %427, %426 : vector<1x32xf32>
    %429 = arith.addf %419, %428 : vector<1x32xf32>
    %c0_184 = arith.constant 0 : index
    %430 = memref.load %arg6[%c0_184] : memref<1xf32, #tpu.memory_space<smem>>
    %431 = vector.broadcast %430 : f32 to vector<1x32xf32>
    %432 = arith.addf %429, %431 : vector<1x32xf32>
    %c6_185 = arith.constant 6 : index
    %c0_186 = arith.constant 0 : index
    %433 = vector.load %arg9[%c6_185, %c0_186] : memref<8x32xf32, #tpu.memory_space<vmem>>, vector<1x32xf32>
    tpu.vector_store %arg9[%c6_185, %c0_186], %432 {strides = array<i32>} : memref<8x32xf32, #tpu.memory_space<vmem>>, vector<1x32xf32>,
    %c8_i32_187 = arith.constant 8 : i32
    %434 = arith.muli %arg0, %c8_i32_187 : i32
    %c7_i32 = arith.constant 7 : i32
    %435 = arith.addi %434, %c7_i32 : i32
    %436 = arith.index_cast %435 : i32 to index
    %437 = memref.load %arg1[%436] : memref<8xi32, #tpu.memory_space<smem>>
    %438 = arith.index_cast %437 : i32 to index
    %c0_188 = arith.constant 0 : index
    %439 = vector.load %arg3[%438, %c0_188] : memref<16x32xf32, #tpu.memory_space<vmem>>, vector<1x32xf32>
    %c7 = arith.constant 7 : index
    %c0_189 = arith.constant 0 : index
    %440 = vector.load %arg8[%c7, %c0_189] : memref<8x32xf32, #tpu.memory_space<vmem>>, vector<1x32xf32>
    tpu.vector_store %arg8[%c7, %c0_189], %439 {strides = array<i32>} : memref<8x32xf32, #tpu.memory_space<vmem>>, vector<1x32xf32>,
    %cst_190 = arith.constant 0.000000e+00 : f32
    %441 = vector.broadcast %cst_190 : f32 to vector<1x32xf32>
    %c5_i32_191 = arith.constant 5 : i32
    %442 = arith.muli %435, %c5_i32_191 : i32
    %c0_i32_192 = arith.constant 0 : i32
    %443 = arith.addi %442, %c0_i32_192 : i32
    %444 = arith.index_cast %443 : i32 to index
    %445 = memref.load %arg2[%444] : memref<40xi32, #tpu.memory_space<smem>>
    %c0_193 = arith.constant 0 : index
    %446 = memref.load %arg5[%c0_193] : memref<5xf32, #tpu.memory_space<smem>>
    %447 = arith.index_cast %445 : i32 to index
    %c0_194 = arith.constant 0 : index
    %448 = vector.load %arg4[%447, %c0_194] : memref<33x32xf32, #tpu.memory_space<vmem>>, vector<1x32xf32>
    %449 = vector.broadcast %446 : f32 to vector<1x32xf32>
    %450 = arith.mulf %449, %448 : vector<1x32xf32>
    %451 = arith.addf %441, %450 : vector<1x32xf32>
    %c5_i32_195 = arith.constant 5 : i32
    %452 = arith.muli %435, %c5_i32_195 : i32
    %c1_i32_196 = arith.constant 1 : i32
    %453 = arith.addi %452, %c1_i32_196 : i32
    %454 = arith.index_cast %453 : i32 to index
    %455 = memref.load %arg2[%454] : memref<40xi32, #tpu.memory_space<smem>>
    %c1_197 = arith.constant 1 : index
    %456 = memref.load %arg5[%c1_197] : memref<5xf32, #tpu.memory_space<smem>>
    %457 = arith.index_cast %455 : i32 to index
    %c0_198 = arith.constant 0 : index
    %458 = vector.load %arg4[%457, %c0_198] : memref<33x32xf32, #tpu.memory_space<vmem>>, vector<1x32xf32>
    %459 = vector.broadcast %456 : f32 to vector<1x32xf32>
    %460 = arith.mulf %459, %458 : vector<1x32xf32>
    %461 = arith.addf %451, %460 : vector<1x32xf32>
    %c5_i32_199 = arith.constant 5 : i32
    %462 = arith.muli %435, %c5_i32_199 : i32
    %c2_i32_200 = arith.constant 2 : i32
    %463 = arith.addi %462, %c2_i32_200 : i32
    %464 = arith.index_cast %463 : i32 to index
    %465 = memref.load %arg2[%464] : memref<40xi32, #tpu.memory_space<smem>>
    %c2_201 = arith.constant 2 : index
    %466 = memref.load %arg5[%c2_201] : memref<5xf32, #tpu.memory_space<smem>>
    %467 = arith.index_cast %465 : i32 to index
    %c0_202 = arith.constant 0 : index
    %468 = vector.load %arg4[%467, %c0_202] : memref<33x32xf32, #tpu.memory_space<vmem>>, vector<1x32xf32>
    %469 = vector.broadcast %466 : f32 to vector<1x32xf32>
    %470 = arith.mulf %469, %468 : vector<1x32xf32>
    %471 = arith.addf %461, %470 : vector<1x32xf32>
    %c5_i32_203 = arith.constant 5 : i32
    %472 = arith.muli %435, %c5_i32_203 : i32
    %c3_i32_204 = arith.constant 3 : i32
    %473 = arith.addi %472, %c3_i32_204 : i32
    %474 = arith.index_cast %473 : i32 to index
    %475 = memref.load %arg2[%474] : memref<40xi32, #tpu.memory_space<smem>>
    %c3_205 = arith.constant 3 : index
    %476 = memref.load %arg5[%c3_205] : memref<5xf32, #tpu.memory_space<smem>>
    %477 = arith.index_cast %475 : i32 to index
    %c0_206 = arith.constant 0 : index
    %478 = vector.load %arg4[%477, %c0_206] : memref<33x32xf32, #tpu.memory_space<vmem>>, vector<1x32xf32>
    %479 = vector.broadcast %476 : f32 to vector<1x32xf32>
    %480 = arith.mulf %479, %478 : vector<1x32xf32>
    %481 = arith.addf %471, %480 : vector<1x32xf32>
    %c5_i32_207 = arith.constant 5 : i32
    %482 = arith.muli %435, %c5_i32_207 : i32
    %c4_i32_208 = arith.constant 4 : i32
    %483 = arith.addi %482, %c4_i32_208 : i32
    %484 = arith.index_cast %483 : i32 to index
    %485 = memref.load %arg2[%484] : memref<40xi32, #tpu.memory_space<smem>>
    %c4_209 = arith.constant 4 : index
    %486 = memref.load %arg5[%c4_209] : memref<5xf32, #tpu.memory_space<smem>>
    %487 = arith.index_cast %485 : i32 to index
    %c0_210 = arith.constant 0 : index
    %488 = vector.load %arg4[%487, %c0_210] : memref<33x32xf32, #tpu.memory_space<vmem>>, vector<1x32xf32>
    %489 = vector.broadcast %486 : f32 to vector<1x32xf32>
    %490 = arith.mulf %489, %488 : vector<1x32xf32>
    %491 = arith.addf %481, %490 : vector<1x32xf32>
    %c0_211 = arith.constant 0 : index
    %492 = memref.load %arg6[%c0_211] : memref<1xf32, #tpu.memory_space<smem>>
    %493 = vector.broadcast %492 : f32 to vector<1x32xf32>
    %494 = arith.addf %491, %493 : vector<1x32xf32>
    %c7_212 = arith.constant 7 : index
    %c0_213 = arith.constant 0 : index
    %495 = vector.load %arg9[%c7_212, %c0_213] : memref<8x32xf32, #tpu.memory_space<vmem>>, vector<1x32xf32>
    tpu.vector_store %arg9[%c7_212, %c0_213], %494 {strides = array<i32>} : memref<8x32xf32, #tpu.memory_space<vmem>>, vector<1x32xf32>,
    %c0_214 = arith.constant 0 : index
    %c0_215 = arith.constant 0 : index
    %496 = vector.load %arg8[%c0_214, %c0_215] : memref<8x32xf32, #tpu.memory_space<vmem>>, vector<8x32xf32>
    %c0_216 = arith.constant 0 : index
    %c0_217 = arith.constant 0 : index
    %497 = vector.load %arg9[%c0_216, %c0_217] : memref<8x32xf32, #tpu.memory_space<vmem>>, vector<8x32xf32>
    %498 = arith.mulf %496, %497 : vector<8x32xf32>
    %cst_218 = arith.constant 0.000000e+00 : f32
    %499 = vector.broadcast %cst_218 : f32 to vector<8x32xf32>
    %500 = tpu.concatenate %496, %498, %497, %499 in 1 : vector<8x32xf32>, vector<8x32xf32>, vector<8x32xf32>, vector<8x32xf32> -> vector<8x128xf32>
    %c0_219 = arith.constant 0 : index
    %c0_220 = arith.constant 0 : index
    %501 = vector.load %arg7[%c0_219, %c0_220] : memref<8x128xf32, #tpu.memory_space<vmem>>, vector<8x128xf32>
    tpu.vector_store %arg7[%c0_219, %c0_220], %500 {strides = array<i32>} : memref<8x128xf32, #tpu.memory_space<vmem>>, vector<8x128xf32>,
    return
  }
  func.func @transform_0(%arg0: i32, %arg1: memref<8xi32, #tpu.memory_space<smem>>, %arg2: memref<40xi32, #tpu.memory_space<smem>>) -> (i32, i32) {
    %c0_i32 = arith.constant 0 : i32
    %c0_i32_0 = arith.constant 0 : i32
    %c0_i32_1 = arith.constant 0 : i32
    return %c0_i32, %c0_i32_0 : i32, i32
  }
  func.func @transform_1(%arg0: i32, %arg1: memref<8xi32, #tpu.memory_space<smem>>, %arg2: memref<40xi32, #tpu.memory_space<smem>>) -> (i32, i32) {
    %c0_i32 = arith.constant 0 : i32
    %c0_i32_0 = arith.constant 0 : i32
    %c0_i32_1 = arith.constant 0 : i32
    return %c0_i32, %c0_i32_0 : i32, i32
  }
  func.func @transform_2(%arg0: i32, %arg1: memref<8xi32, #tpu.memory_space<smem>>, %arg2: memref<40xi32, #tpu.memory_space<smem>>) -> i32 {
    %c0_i32 = arith.constant 0 : i32
    %c0_i32_0 = arith.constant 0 : i32
    return %c0_i32 : i32
  }
  func.func @transform_3(%arg0: i32, %arg1: memref<8xi32, #tpu.memory_space<smem>>, %arg2: memref<40xi32, #tpu.memory_space<smem>>) -> i32 {
    %c0_i32 = arith.constant 0 : i32
    %c0_i32_0 = arith.constant 0 : i32
    return %c0_i32 : i32
  }
  func.func @transform_4(%arg0: i32, %arg1: memref<8xi32, #tpu.memory_space<smem>>, %arg2: memref<40xi32, #tpu.memory_space<smem>>) -> (i32, i32) {
    %c0_i32 = arith.constant 0 : i32
    %c0_i32_0 = arith.constant 0 : i32
    return %arg0, %c0_i32 : i32, i32
  }
}

</mosaic_0001>

<bundles_post_ra>
// kernel: tpu_custom_call.1
= control target key start
LH: loop header
LB: loop body
LE: loop exit
PB: predicated region body
PF: predicated region fallthrough
CT: control target
= control target key end

     0   :  { %s1068_s0 = inlined_call_operand.vmem [shape: s32[8], index: 0, kind: input, shape index: {}]   ;;  %s1069_s2 = inlined_call_operand.vmem [shape: f32[16,32], index: 2, kind: input, shape index: {}]   ;;  %s1070_s3 = inlined_call_operand.vmem [shape: f32[33,32], index: 3, kind: input, shape index: {}]   ;;  %s1071_s4 = inlined_call_operand.vmem [shape: f32[5], index: 4, kind: input, shape index: {}]   ;;  %s1072_s5 = inlined_call_operand.<no memory space> [shape: f32[1], index: 5, kind: input, shape index: {}]   ;;  %s1073_s6 = inlined_call_operand.hbm [shape: f32[8,128], index: 6, kind: output, shape index: {}]   ;;  %s1074_s1 = inlined_call_operand.vmem [shape: s32[40], index: 1, kind: input, shape index: {}]  }
   0x1   :  { %s11_s23 = sshll.u32 %s1068_s0, 4  ;;  %s15_s26 = sshll.u32 %s1074_s1, 4  ;;  %s12_s23 = int_to_ptr.vmem [resolvable:$true] %s11_s23  ;;  %s16_s26 = int_to_ptr.vmem [resolvable:$true] %s15_s26 }
   0x2   :  { %s602_s27 = scalar_lea.vmem %s12_s23, 16  ;;  %p607_p1 = scmp.lt.s32.totalorder %s12_s23, %s12_s23 }
   0x3   :  { %p603_p0 = scmp.ne.s32.totalorder %s12_s23, %s602_s27  ;;  %p608_p2 = scmp.lt.s32.totalorder %s602_s27, %s602_s27 }
   0x5   :  { %p609_p3 = por %p608_p2, %p607_p1 }
   0x7   :  { %p610_p4 = pnand %p609_p3, %p603_p0 }
   0x9   :  { %613 = shalt.err (!%p610_p4)  }
   0xa   :  { %s666_s28 = smov [#allocation5]   ;;  %s614_s29 = scalar_lea.vmem %s16_s26, 16 }
   0xb   :  { %14 = dma.vmem_to_smem %s12_s23, 16, %s666_s28, [#allocation4] }
   0xc   :  { %p615_p5 = scmp.ne.s32.totalorder %s16_s26, %s614_s29  ;;  %p619_p6 = scmp.lt.s32.totalorder %s16_s26, %s16_s26 }
   0xd   :  { %p620_p7 = scmp.lt.s32.totalorder %s614_s29, %s614_s29 }
   0xf   :  { %p621_p8 = por %p620_p7, %p619_p6 }
  0x11   :  { %p622_p9 = pnand %p621_p8, %p615_p5 }
  0x13   :  { %625 = shalt.err (!%p622_p9)  }
  0x14   :  { %s667_s0 = smov [#allocation6]  }
  0x15   :  { %18 = dma.vmem_to_smem %s16_s26, 16, %s667_s0, [#allocation4] }
  0x16   :  { %660 = dma.done.wait [#allocation4], 32 }
  0x17   :  { %661 = vsyncadd [#allocation4], 4294967264 }
  0x18   :  { %21 = sfence }
  0x19   :  { %22 = vsyncpa [#allocation10], 0 }
  0x1a   :  { %23 = vsyncpa [#allocation9], 0  ;;  %s34_s7 = sshll.u32 %s1071_s4, 4  ;;  %s35_s7 = int_to_ptr.vmem [resolvable:$true] %s34_s7 }
  0x1b   :  { %s626_s8 = scalar_lea.vmem %s35_s7, 16  ;;  %p631_p11 = scmp.lt.s32.totalorder %s35_s7, %s35_s7 }
  0x1c   :  { %p627_p10 = scmp.ne.s32.totalorder %s35_s7, %s626_s8  ;;  %p632_p12 = scmp.lt.s32.totalorder %s626_s8, %s626_s8 }
  0x1e   :  { %p633_p13 = por %p632_p12, %p631_p11 }
  0x20   :  { %p634_p0 = pnand %p633_p13, %p627_p10 }
  0x22   :  { %637 = shalt.err (!%p634_p0)
}
  0x23   :  { %s668_s9 = smov [#allocation8]  }
  0x24   :  { %37 = dma.vmem_to_smem %s35_s7, 16, %s668_s9, [#allocation10]  }
  0x25   :  { %662 = dma.done.wait [#allocation10], 16  }
  0x26   :  { %663 = vsyncadd [#allocation10], 4294967280 }
  0x27   :  { %43 = sfence }
  0x28   :  { %s45_s10 = sld [smem:[#allocation5]]  ;;  %s518_s13 = sld [smem:[#allocation6 + $0x1]]  ;;  %vm48_vm0 = vcmask 253952   ;;  %v796_v23 = vstv %s1072_s5  ;;  %vm448_vm1 = vcmask 261120   ;;  %vm450_vm2 = vcmask 523264  }
  0x29   :  { %s51_s11 = sld [smem:[#allocation6]]  ;;  %s519_s14 = sld [smem:[#allocation8 + $0x1]]  ;;  %vm452_vm3 = vcmask 785408  }
  0x2a   :  { %s52_s12 = sld [smem:[#allocation8]]  ;;  %s520_s15 = sld [smem:[#allocation6 + $0x2]] }
  0x2b   :  { %s521_s4 = sld [smem:[#allocation8 + $0x2]]  ;;  %s522_s16 = sld [smem:[#allocation6 + $0x3]] }
  0x2c   :  { %s523_s17 = sld [smem:[#allocation8 + $0x3]]  ;;  %s716_s18 = sld [smem:[#allocation6 + $0x4]] }
  0x2d   :  { %s525_s19 = sld [smem:[#allocation8 + $0x4]]  ;;  %s718_s20 = sld [smem:[#allocation5 + $0x1]] }
  0x2e   :  { %s46_s23 = scalar_lea.vmem %s1069_s2, %s45_s10  ;;  %s61_s29 = scalar_lea.vmem %s1070_s3, %s518_s13 }
  0x2f   :  { %s53_s26 = scalar_lea.vmem %s1070_s3, %s51_s11  ;;  %v47_v0 = vld [vmem:[%s46_s23] sm:$0x1]  ;;  %s731_s0 = sld [smem:[#allocation6 + $0x5]]  ;;  %v735_v5 = vstv %s519_s14 }
  0x30   :  { %v54_v1 = vld [vmem:[%s53_s26] sm:$0x1]  ;;  %v726_v2 = vstv %s52_s12  ;;  %49 = vst.msk [vmem:[#allocation2] sm:$0x1] %vm48_vm0, %v47_v0  ;;  %s69_s7 = scalar_lea.vmem %s1070_s3, %s520_s15  ;;  %s740_s8 = sld [smem:[#allocation6 + $0x6]] }
  0x31   :  { %v56_v3 = vmul.f32 %v726_v2, %v54_v1  ;;  %v62_v4 = vld [vmem:[%s61_s29] sm:$0x1]  ;;  %v743_v8 = vstv %s521_s4  ;;  %s77_s11 = scalar_lea.vmem %s1070_s3, %s522_s16  ;;  %s748_s12 = sld [smem:[#allocation6 + $0x7]] }
  0x32   :  { %v64_v6 = vmul.f32 %v735_v5, %v62_v4  ;;  %v70_v7 = vld [vmem:[%s69_s7] sm:$0x1]  ;;  %v751_v11 = vstv %s523_s17  ;;  %s85_s15 = scalar_lea.vmem %s1070_s3, %s716_s18  ;;  %s757_s21 = sld [smem:[#allocation6 + $0x8]] }
  0x33   :  { %v72_v9 = vmul.f32 %v743_v8, %v70_v7  ;;  %v78_v10 = vld [vmem:[%s77_s11] sm:$0x1]  ;;  %v760_v15 = vstv %s525_s19  ;;  %s96_s22 = scalar_lea.vmem %s1069_s2, %s718_s20  ;;  %s766_s17 = sld [smem:[#allocation6 + $0x9]] }
  0x34   :  { %v65_v12 = vadd.f32 %v64_v6, %v56_v3  ;;  %v80_v13 = vmul.f32 %v751_v11, %v78_v10  ;;  %v86_v14 = vld [vmem:[%s85_s15] sm:$0x1]  ;;  %s768_s23 = sld [smem:[#allocation5 + $0x2]]  ;;  %s778_s26 = sld [smem:[#allocation6 + $0xb]] }
  0x35   :  { %v97_v16 = vld [vmem:[%s96_s22] sm:$0x1]  ;;  %s770_s18 = sld [smem:[#allocation6 + $0xa]]  ;;  %v88_v18 = vmul.f32 %v760_v15, %v86_v14  ;;  %s102_s25 = scalar_lea.vmem %s1070_s3, %s731_s0 }
  0x36   :  { %v73_v17 = vadd.f32 %v72_v9, %v65_v12  ;;  %98 = vst.msk [vmem:[#allocation2 + $0x1] sm:$0x1] %vm48_vm0, %v97_v16  ;;  %v103_v19 = vld [vmem:[%s102_s25] sm:$0x1]  ;;  %s110_s28 = scalar_lea.vmem %s1070_s3, %s740_s8  ;;  %s784_s29 = sld [smem:[#allocation6 + $0xc]] }
  0x37   :  { %v105_v21 = vmul.f32 %v103_v19, %v726_v2  ;;  %v111_v22 = vld [vmem:[%s110_s28] sm:$0x1]  ;;  %s118_s7 = scalar_lea.vmem %s1070_s3, %s748_s12  ;;  %s791_s0 = sld [smem:[#allocation6 + $0xd]] }
  0x38   :  { %v81_v20 = vadd.f32 %v80_v13, %v73_v17  ;;  %v113_v24 = vmul.f32 %v111_v22, %v735_v5  ;;  %v119_v25 = vld [vmem:[%s118_s7] sm:$0x1]  ;;  %s126_s13 = scalar_lea.vmem %s1070_s3, %s757_s21  ;;  %s803_s14 = sld [smem:[#allocation6 + $0xe]] }
  0x39   :  { %v121_v27 = vmul.f32 %v119_v25, %v743_v8  ;;  %v127_v28 = vld [vmem:[%s126_s13] sm:$0x1]  ;;  %s134_s4 = scalar_lea.vmem %s1070_s3, %s766_s17  ;;  %s810_s5 = sld [smem:[#allocation5 + $0x3]] }
  0x3a   :  { %v89_v26 = vadd.f32 %v88_v18, %v81_v20  ;;  %v114_v29 = vadd.f32 %v113_v24, %v105_v21  ;;  %v129_v30 = vmul.f32 %v127_v28, %v751_v11  ;;  %v135_v31 = vld [vmem:[%s134_s4] sm:$0x1]  ;;  %s145_s21 = scalar_lea.vmem %s1069_s2, %s768_s23  ;;  %s159_s27 = scalar_lea.vmem %s1070_s3, %s778_s26 }
  0x3b   :  { %s151_s25 = scalar_lea.vmem %s1070_s3, %s770_s18  ;;  %v146_v33 = vld [vmem:[%s145_s21] sm:$0x1]  ;;  %s826_s28 = sld [smem:[#allocation6 + $0xf]]  ;;  %v137_v36 = vmul.f32 %v135_v31, %v760_v15 }
  0x3c   :  { %v92_v32 = vadd.f32 %v796_v23, %v89_v26  ;;  %v152_v34 = vld [vmem:[%s151_s25] sm:$0x1]  ;;  %v122_v35 = vadd.f32 %v121_v27, %v114_v29  ;;  %147 = vst.msk [vmem:[#allocation2 + $0x2] sm:$0x1] %vm48_vm0, %v146_v33  ;;  %s167_s1 = scalar_lea.vmem %s1070_s3, %s784_s29  ;;  %s835_s30 = sld [smem:[#allocation6 + $0x10]] }
  0x3d   :  { %v154_v37 = vmul.f32 %v152_v34, %v726_v2  ;;  %v160_v38 = vld [vmem:[%s159_s27] sm:$0x1]  ;;  %s175_s9 = scalar_lea.vmem %s1070_s3, %s791_s0  ;;  %s843_s10 = sld [smem:[#allocation6 + $0x11]] }
  0x3e   :  { %93 = vst.msk [vmem:[#allocation3] sm:$0x1] %vm48_vm0, %v92_v32  ;;  %v162_v39 = vmul.f32 %v160_v38, %v735_v5  ;;  %v168_v40 = vld [vmem:[%s167_s1] sm:$0x1]  ;;  %v130_v41 = vadd.f32 %v129_v30, %v122_v35  ;;  %s183_s11 = scalar_lea.vmem %s1070_s3, %s803_s14  ;;  %s850_s13 = sld [smem:[#allocation6 + $0x12]] }
  0x3f   :  { %v170_v42 = vmul.f32 %v168_v40, %v743_v8  ;;  %v176_v43 = vld [vmem:[%s175_s9] sm:$0x1]  ;;  %s194_s15 = scalar_lea.vmem %s1069_s2, %s810_s5  ;;  %s857_s4 = sld [smem:[#allocation6 + $0x13]] }
  0x40   :  { %v163_v44 = vadd.f32 %v162_v39, %v154_v37  ;;  %v178_v45 = vmul.f32 %v176_v43, %v751_v11  ;;  %v184_v46 = vld [vmem:[%s183_s11] sm:$0x1]  ;;  %v138_v47 = vadd.f32 %v137_v36, %v130_v41  ;;  %s859_s16 = sld [smem:[#allocation5 + $0x4]]  ;;  %s869_s5 = sld [smem:[#allocation6 + $0x15]] }
  0x41   :  { %v195_v48 = vld [vmem:[%s194_s15] sm:$0x1]  ;;  %s861_s22 = sld [smem:[#allocation6 + $0x14]]  ;;  %v186_v50 = vmul.f32 %v184_v46, %v760_v15  ;;  %s200_s19 = scalar_lea.vmem %s1070_s3, %s826_s28 }
  0x42   :  { %v171_v49 = vadd.f32 %v170_v42, %v163_v44  ;;  %196 = vst.msk [vmem:[#allocation2 + $0x3] sm:$0x1] %vm48_vm0, %v195_v48  ;;  %v141_v51 = vadd.f32 %v138_v47, %v796_v23  ;;  %v201_v52 = vld [vmem:[%s200_s19] sm:$0x1]  ;;  %s208_s17 = scalar_lea.vmem %s1070_s3, %s835_s30  ;;  %s876_s20 = sld [smem:[#allocation6 + $0x16]] }
  0x43   :  { %v203_v54 = vmul.f32 %v201_v52, %v726_v2  ;;  %v209_v55 = vld [vmem:[%s208_s17] sm:$0x1]  ;;  %s216_s28 = scalar_lea.vmem %s1070_s3, %s843_s10  ;;  %s883_s18 = sld [smem:[#allocation6 + $0x17]] }
  0x44   :  { %v179_v53 = vadd.f32 %v178_v45, %v171_v49  ;;  %142 = vst.msk [vmem:[#allocation3 + $0x1] sm:$0x1] %vm48_vm0, %v141_v51  ;;  %v211_v56 = vmul.f32 %v209_v55, %v735_v5  ;;  %v217_v57 = vld [vmem:[%s216_s28] sm:$0x1]  ;;  %s224_s26 = scalar_lea.vmem %s1070_s3, %s850_s13  ;;  %s891_s7 = sld [smem:[#allocation6 + $0x18]] }
  0x45   :  { %v219_v59 = vmul.f32 %v217_v57, %v743_v8  ;;  %v225_v60 = vld [vmem:[%s224_s26] sm:$0x1]  ;;  %s232_s8 = scalar_lea.vmem %s1070_s3, %s857_s4  ;;  %s898_s29 = sld [smem:[#allocation5 + $0x5]] }
  0x46   :  { %v187_v58 = vadd.f32 %v186_v50, %v179_v53  ;;  %v212_v61 = vadd.f32 %v211_v56, %v203_v54  ;;  %v227_v62 = vmul.f32 %v225_v60, %v751_v11  ;;  %v233_v63 = vld [vmem:[%s232_s8] sm:$0x1]  ;;  %s243_s13 = scalar_lea.vmem %s1069_s2, %s859_s16  ;;  %s257_s19 = scalar_lea.vmem %s1070_s3, %s869_s5 }
  0x47   :  { %s249_s14 = scalar_lea.vmem %s1070_s3, %s861_s22  ;;  %v244_v1 = vld [vmem:[%s243_s13] sm:$0x1]  ;;  %s914_s24 = sld [smem:[#allocation6 + $0x19]]  ;;  %v235_v6 = vmul.f32 %v233_v63, %v760_v15 }
  0x48   :  { %v190_v0 = vadd.f32 %v187_v58, %v796_v23  ;;  %v250_v3 = vld [vmem:[%s249_s14] sm:$0x1]  ;;  %v220_v4 = vadd.f32 %v219_v59, %v212_v61  ;;  %245 = vst.msk [vmem:[#allocation2 + $0x4] sm:$0x1] %vm48_vm0, %v244_v1  ;;  %s265_s25 = scalar_lea.vmem %s1070_s3, %s876_s20  ;;  %s923_s17 = sld [smem:[#allocation6 + $0x1a]] }
  0x49   :  { %v252_v7 = vmul.f32 %v250_v3, %v726_v2  ;;  %v258_v9 = vld [vmem:[%s257_s19] sm:$0x1]  ;;  %s273_s23 = scalar_lea.vmem %s1070_s3, %s883_s18  ;;  %s931_s28 = sld [smem:[#allocation6 + $0x1b]] }
  0x4a   :  { %191 = vst.msk [vmem:[#allocation3 + $0x2] sm:$0x1] %vm48_vm0, %v190_v0  ;;  %v260_v10 = vmul.f32 %v258_v9, %v735_v5  ;;  %v266_v12 = vld [vmem:[%s265_s25] sm:$0x1]  ;;  %v228_v13 = vadd.f32 %v227_v62, %v220_v4  ;;  %s281_s30 = scalar_lea.vmem %s1070_s3, %s891_s7  ;;  %s938_s26 = sld [smem:[#allocation6 + $0x1c]] }
  0x4b   :  { %v268_v14 = vmul.f32 %v266_v12, %v743_v8  ;;  %v274_v16 = vld [vmem:[%s273_s23] sm:$0x1]  ;;  %s292_s10 = scalar_lea.vmem %s1069_s2, %s898_s29  ;;  %s945_s8 = sld [smem:[#allocation6 + $0x1d]] }
  0x4c   :  { %v261_v17 = vadd.f32 %v260_v10, %v252_v7  ;;  %v276_v18 = vmul.f32 %v274_v16, %v751_v11  ;;  %v282_v19 = vld [vmem:[%s281_s30] sm:$0x1]  ;;  %v236_v20 = vadd.f32 %v235_v6, %v228_v13  ;;  %s947_s11 = sld [smem:[#allocation5 + $0x6]]  ;;  %s957_s29 = sld [smem:[#allocation6 + $0x1f]] }
  0x4d   :  { %v293_v21 = vld [vmem:[%s292_s10] sm:$0x1]  ;;  %s949_s12 = sld [smem:[#allocation6 + $0x1e]]  ;;  %v284_v24 = vmul.f32 %v282_v19, %v760_v15  ;;  %s298_s0 = scalar_lea.vmem %s1070_s3, %s914_s24 }
  0x4e   :  { %v269_v22 = vadd.f32 %v268_v14, %v261_v17  ;;  %294 = vst.msk [vmem:[#allocation2 + $0x5] sm:$0x1] %vm48_vm0, %v293_v21  ;;  %v239_v25 = vadd.f32 %v236_v20, %v796_v23  ;;  %v299_v26 = vld [vmem:[%s298_s0] sm:$0x1]  ;;  %s306_s4 = scalar_lea.vmem %s1070_s3, %s923_s17  ;;  %s964_s21 = sld [smem:[#allocation6 + $0x20]] }
  0x4f   :  { %v301_v28 = vmul.f32 %v299_v26, %v726_v2  ;;  %v307_v29 = vld [vmem:[%s306_s4] sm:$0x1]  ;;  %s314_s24 = scalar_lea.vmem %s1070_s3, %s931_s28  ;;  %s971_s22 = sld [smem:[#allocation6 + $0x21]] }
  0x50   :  { %v277_v27 = vadd.f32 %v276_v18, %v269_v22  ;;  %240 = vst.msk [vmem:[#allocation3 + $0x3] sm:$0x1] %vm48_vm0, %v239_v25  ;;  %v309_v30 = vmul.f32 %v307_v29, %v735_v5  ;;  %v315_v31 = vld [vmem:[%s314_s24] sm:$0x1]  ;;  %s322_s5 = scalar_lea.vmem %s1070_s3, %s938_s26  ;;  %s979_s27 = sld [smem:[#allocation6 + $0x22]] }
  0x51   :  { %v317_v33 = vmul.f32 %v315_v31, %v743_v8  ;;  %v323_v34 = vld [vmem:[%s322_s5] sm:$0x1]  ;;  %s330_s1 = scalar_lea.vmem %s1070_s3, %s945_s8  ;;  %s986_s20 = sld [smem:[#allocation5 + $0x7]] }
  0x52   :  { %v285_v32 = vadd.f32 %v284_v24, %v277_v27  ;;  %v310_v35 = vadd.f32 %v309_v30, %v301_v28  ;;  %v325_v36 = vmul.f32 %v323_v34, %v751_v11  ;;  %v331_v37 = vld [vmem:[%s330_s1] sm:$0x1]  ;;  %s341_s26 = scalar_lea.vmem %s1069_s2, %s947_s11  ;;  %s355_s0 = scalar_lea.vmem %s1070_s3, %s957_s29 }
  0x53   :  { %s347_s7 = scalar_lea.vmem %s1070_s3, %s949_s12  ;;  %v342_v39 = vld [vmem:[%s341_s26] sm:$0x1]  ;;  %s1002_s15 = sld [smem:[#allocation6 + $0x23]]  ;;  %v333_v42 = vmul.f32 %v331_v37, %v760_v15 }
  0x54   :  { %v288_v38 = vadd.f32 %v285_v32, %v796_v23  ;;  %v348_v40 = vld [vmem:[%s347_s7] sm:$0x1]  ;;  %v318_v41 = vadd.f32 %v317_v33, %v310_v35  ;;  %343 = vst.msk [vmem:[#allocation2 + $0x6] sm:$0x1] %vm48_vm0, %v342_v39  ;;  %s363_s14 = scalar_lea.vmem %s1070_s3, %s964_s21  ;;  %s588_s4 = sld [smem:[#allocation6 + $0x24]] }
  0x55   :  { %v350_v43 = vmul.f32 %v348_v40, %v726_v2  ;;  %v356_v44 = vld [vmem:[%s355_s0] sm:$0x1]  ;;  %s371_s16 = scalar_lea.vmem %s1070_s3, %s971_s22  ;;  %s590_s24 = sld [smem:[#allocation6 + $0x25]] }
  0x56   :  { %289 = vst.msk [vmem:[#allocation3 + $0x4] sm:$0x1] %vm48_vm0, %v288_v38  ;;  %v358_v45 = vmul.f32 %v356_v44, %v735_v5  ;;  %v364_v46 = vld [vmem:[%s363_s14] sm:$0x1]  ;;  %v326_v47 = vadd.f32 %v325_v36, %v318_v41  ;;  %s379_s21 = scalar_lea.vmem %s1070_s3, %s979_s27  ;;  %s592_s5 = sld [smem:[#allocation6 + $0x26]] }
  0x57   :  { %v366_v48 = vmul.f32 %v364_v46, %v743_v8  ;;  %v372_v49 = vld [vmem:[%s371_s16] sm:$0x1]  ;;  %s390_s1 = scalar_lea.vmem %s1069_s2, %s986_s20  ;;  %s594_s22 = sld [smem:[#allocation6 + $0x27]] }
  0x58   :  { %v359_v50 = vadd.f32 %v358_v45, %v350_v43  ;;  %v374_v51 = vmul.f32 %v372_v49, %v751_v11  ;;  %v380_v52 = vld [vmem:[%s379_s21] sm:$0x1]  ;;  %v334_v53 = vadd.f32 %v333_v42, %v326_v47  ;;  %s670_s14 = smov 64  }
  0x59   :  { %v391_v54 = vld [vmem:[%s390_s1] sm:$0x1]  ;;  %v382_v56 = vmul.f32 %v380_v52, %v760_v15  ;;  %s396_s27 = scalar_lea.vmem %s1070_s3, %s1002_s15 }
  0x5a   :  { %v367_v55 = vadd.f32 %v366_v48, %v359_v50  ;;  %392 = vst.msk [vmem:[#allocation2 + $0x7] sm:$0x1] %vm48_vm0, %v391_v54  ;;  %v337_v57 = vadd.f32 %v334_v53, %v796_v23  ;;  %v397_v58 = vld [vmem:[%s396_s27] sm:$0x1]  ;;  %s404_s10 = scalar_lea.vmem %s1070_s3, %s588_s4  ;;  %s671_s4 = smov [#allocation11]  }
  0x5b   :  { %v399_v60 = vmul.f32 %v397_v58, %v726_v2  ;;  %v405_v61 = vld [vmem:[%s404_s10] sm:$0x1]  ;;  %s412_s7 = scalar_lea.vmem %s1070_s3, %s590_s24  ;;  %s461_s29 = sshll.u32 %s671_s4, 4  ;;  %s462_s29 = int_to_ptr.vmem [resolvable:$true] %s461_s29 }
  0x5c   :  { %v375_v59 = vadd.f32 %v374_v51, %v367_v55  ;;  %338 = vst.msk [vmem:[#allocation3 + $0x5] sm:$0x1] %vm48_vm0, %v337_v57  ;;  %v407_v62 = vmul.f32 %v405_v61, %v735_v5  ;;  %v413_v63 = vld [vmem:[%s412_s7] sm:$0x1]  ;;  %s420_s0 = scalar_lea.vmem %s1070_s3, %s592_s5  ;;  %s638_s19 = scalar_lea.vmem %s462_s29, 128 }
  0x5d   :  { %v415_v1 = vmul.f32 %v413_v63, %v743_v8  ;;  %v421_v3 = vld [vmem:[%s420_s0] sm:$0x1]  ;;  %s428_s12 = scalar_lea.vmem %s1070_s3, %s594_s22  ;;  %s669_s3 = smov 32  }
  0x5e   :  { %v383_v0 = vadd.f32 %v382_v56, %v375_v59  ;;  %v408_v2 = vadd.f32 %v407_v62, %v399_v60  ;;  %v423_v4 = vmul.f32 %v421_v3, %v751_v11  ;;  %v429_v6 = vld [vmem:[%s428_s12] sm:$0x1]  ;;  %p639_p1 = scmp.ne.s32.totalorder %s462_s29, %s638_s19  ;;  %p643_p2 = scmp.lt.s32.totalorder %s462_s29, %s462_s29 }
  0x5f   :  { %v431_v9 = vmul.f32 %v429_v6, %v760_v15  ;;  %p644_p3 = scmp.lt.s32.totalorder %s638_s19, %s638_s19 }
  0x60   :  { %v386_v7 = vadd.f32 %v383_v0, %v796_v23  ;;  %v416_v5 = vadd.f32 %v415_v1, %v408_v2 }
  0x61   :  { %v437_v13 = vld [vmem:[#allocation2] sm:$0xff]  ;;  %p645_p4 = por %p644_p3, %p643_p2 }
  0x62   :  { %387 = vst.msk [vmem:[#allocation3 + $0x6] sm:$0x1] %vm48_vm0, %v386_v7  ;;  %v424_v10 = vadd.f32 %v423_v4, %v416_v5 }
  0x63   :  { %p646_p5 = pnand %p645_p4, %p639_p1 }
  0x64   :  { %v432_v12 = vadd.f32 %v431_v9, %v424_v10 }
  0x66   :  { %v435_v8 = vadd.f32 %v432_v12, %v796_v23 }
  0x68   :  { %436 = vst.msk [vmem:[#allocation3 + $0x7] sm:$0x1] %vm48_vm0, %v435_v8 }
  0x6f   :  { %v438_v14 = vld [vmem:[#allocation3] sm:$0xff] }
  0x70   :  { %v439_v16 = vmul.f32 %v438_v14, %v437_v13 }
  0x72   :  { %441 = vrot.lane.b32.xlu0 %v439_v16, %s669_s3 }
  0x76   :  { %445 = vrot.lane.b32.xlu0 %v438_v14, %s670_s14 }
  0xe4   :  { %v442_v11 = vpop.permute.xlu0 %441 }
  0xe5   :  { %v449_v17 = vsel %vm448_vm1, %v437_v13, %v442_v11 }
  0xe8   :  { %v446_v15 = vpop.permute.xlu0 %445 }
  0xe9   :  { %v451_v18 = vsel %vm450_vm2, %v449_v17, %v446_v15 }
  0xea   :  { %v453_v23 = vsel %vm452_vm3, %v451_v18, 0.0 }
  0xeb   :  { %454 = vst [vmem:[#allocation11] sm:$0xff] %v453_v23 }
  0xec   :  { %649 = shalt.err (!%p646_p5)
}
  0xed   :  { %s650_s25 = scalar_lea.hbm %s1073_s6, 128 }
  0xee   :  { %p651_p6 = scmp.ne.s32.totalorder %s1073_s6, %s650_s25  ;;  %p654_p7 = scmp.lt.u32.totalorder %s650_s25, %s1073_s6 }
  0xf0   :  { %p656_p8 = pnand %p654_p7, %p651_p6 }
  0xf2   :  { %659 = shalt.err (!%p656_p8)
}
  0xf3   :  { %464 = dma.vmem_to_hbm [thread:$0]  %s462_s29, 128, %s1073_s6, [#allocation9]  }
  0xf4   :  { %664 = dma.done.wait [#allocation9], 128  }
  0xf5   :  { %665 = vsyncadd [#allocation9], 4294967168 }
  0xf6   :  { %468 = vsyncpa [#allocation9], 1 }
  0xf7   :  { %469 = vsyncpa [#allocation10], 1 }

</bundles_post_ra>
